<compile_context>
chip_gen: v5e
topology: v5e:2x2
jax: 0.10.0
libtpu: 0.0.40
codegen_flags: <defaults>
</compile_context>

<pallas_src>
import math
import numpy as np
import jax
import jax.numpy as jnp
from jax.experimental import pallas as pl
from jax.experimental.pallas import tpu as pltpu


_TARGET_BLOCK_BYTES = 4 << 20      # ~4 MiB f32 output block (8 MiB double-buffered)
_VMEM_LIMIT_BYTES = 32 * 1024 * 1024  # raise v5e's 16 MiB default; <= every chip's physical VMEM
_MAX_LANE_TILE = 32768             # slab path: lane tiles up to 32768 (review item 2)


def construct_log_spaced_freqs(max_num_frames: int, skip_small_t_freqs: int = 0) -> np.ndarray:
    """Numpy port of the PyTorch helper. Returns [1, F] float32."""
    time_resolution = 2 ** np.ceil(np.log2(max_num_frames))
    num_fourier_feats = int(np.ceil(np.log2(time_resolution)))
    powers = (2 ** np.arange(num_fourier_feats)).astype(np.float32)
    powers = powers[: len(powers) - skip_small_t_freqs] if skip_small_t_freqs > 0 else powers
    fourier_coefs = powers[None, :] * np.pi
    return (fourier_coefs / time_resolution).astype(np.float32)


def _choose_tile(total: int, gran: int, row_bytes: int, max_tile: int):
    """Tile along the timestep axis: VMEM-budget sized, `gran`-aligned, >=2 grid steps
    when there is more than one minimal tile of work (v7x megacore sharding)."""
    tile = (_TARGET_BLOCK_BYTES // row_bytes) // gran * gran
    tile = max(gran, min(tile, max_tile))
    total_ceil = pl.cdiv(total, gran) * gran
    tile = min(tile, total_ceil)
    if total_ceil >= 2 * gran:
        tile = min(tile, pl.cdiv(pl.cdiv(total_ceil, 2), gran) * gran)
    padded = pl.cdiv(total, tile) * tile
    return tile, padded


def _slab_kernel(coef_ref, t_ref, o_ref):
    # coef_ref: (F, 1)   f32 -- fourier coefficients on sublanes (resident block)
    # t_ref:    (1, tm)  f32 -- timesteps on the lane axis (lane-dense)
    # o_ref:    (2F, tm) f32 -- sublane rows [0, F) = sin, [F, 2F) = cos
    F = coef_ref.shape[0]
    raw = coef_ref[...] * t_ref[...]          # (F, tm) broadcast outer product (VPU)
    o_ref[0:F, :] = jnp.sin(raw)              # full-lane-width, unmasked stores
    o_ref[F:, :] = jnp.cos(raw)


def _direct_kernel(coef_ref, t_ref, o_ref):
    # coef_ref: (1, F)   f32 -- fourier coefficients on lanes (resident block), F % 128 == 0
    # t_ref:    (tr, 1)  f32 -- timesteps on sublanes
    # o_ref:    (tr, 2F) f32 -- lanes [0, F) = sin, [F, 2F) = cos; slices on 128-lane boundaries
    F = coef_ref.shape[1]
    raw = t_ref[...] * coef_ref[...]          # (tr, F) broadcast outer product (VPU)
    o_ref[:, 0:F] = jnp.sin(raw)              # unmasked: F is a multiple of 128
    o_ref[:, F:] = jnp.cos(raw)


class FixedTimeEncoder:
    """JAX/Pallas equivalent of the PyTorch FixedTimeEncoder forward pass."""

    def __init__(self, max_num_frames: int, transformer_pe: bool = False,
                 d_model: int = 512, skip_small_t_freqs: int = 0):
        assert max_num_frames >= 1, f"Wrong max_num_frames: {max_num_frames}"
        # Frame indices are cast to f32 in forward(); keep them exactly representable.
        assert max_num_frames < 2 ** 24, "frame indices would lose precision in float32"
        if transformer_pe:
            assert skip_small_t_freqs == 0, "Cant use `skip_small_t_freqs` with `transformer_pe`"
            coefs = np.exp(np.arange(0, d_model, 2, dtype=np.float32)
                           * (-math.log(10000.0) / d_model))[None, :]
        else:
            coefs = construct_log_spaced_freqs(max_num_frames,
                                               skip_small_t_freqs=skip_small_t_freqs)
        coefs = np.asarray(coefs, dtype=np.float32)                    # [1, F] (buffer parity)
        self.fourier_coefs = jnp.asarray(coefs)                        # [1, F]
        self._coefs_col = jnp.asarray(np.ascontiguousarray(coefs.T))   # [F, 1] for slab kernel

    def get_dim(self) -> int:
        return self.fourier_coefs.shape[1] * 2

    def progressive_update(self, curr_kimg):   # parity with the torch module (no-op)
        pass

    def __call__(self, t: jax.Array) -> jax.Array:
        assert t.ndim == 2, f"Wrong shape: {t.shape}"
        F = self.fourier_coefs.shape[1]
        two_f = 2 * F
        M = t.shape[0] * t.shape[1]
        t_flat = t.reshape(-1).astype(jnp.float32)
        if F % 128 == 0:
            return self._forward_direct(t_flat, M, F, two_f)
        return self._forward_slab(t_flat, M, F, two_f)

    # --- transformer_pe-style path: F multiple of 128 -> direct [M, 2F], no transpose ---
    def _forward_direct(self, t_flat, M, F, two_f):
        SUB = 8
        tr, M_pad = _choose_tile(M, SUB, two_f * 4, 1 << 20)
        if M_pad != M:
            t_flat = jnp.pad(t_flat, (0, M_pad - M))
        t_col = t_flat.reshape(M_pad, 1)

        out = pl.pallas_call(
            _direct_kernel,
            out_shape=jax.ShapeDtypeStruct((M_pad, two_f), jnp.float32),
            grid_spec=pltpu.PrefetchScalarGridSpec(
                num_scalar_prefetch=0,
                grid=(M_pad // tr,),
                in_specs=[
                    pl.BlockSpec((1, F), lambda i: (0, 0)),     # coefs, resident
                    pl.BlockSpec((tr, 1), lambda i: (i, 0)),    # timesteps on sublanes
                ],
                out_specs=pl.BlockSpec((tr, two_f), lambda i: (i, 0)),
            ),
            compiler_params=pltpu.CompilerParams(
                dimension_semantics=("parallel",),
                vmem_limit_bytes=_VMEM_LIMIT_BYTES),
        )(self.fourier_coefs, t_col)
        return out[:M]                                           # already [M, 2F]

    # --- default log-spaced path: tiny F -> lane-dense [2F, M] slab, large lane tiles ---
    def _forward_slab(self, t_flat, M, F, two_f):
        LANE = 128
        tm, M_pad = _choose_tile(M, LANE, two_f * 4, _MAX_LANE_TILE)
        if M_pad != M:
            t_flat = jnp.pad(t_flat, (0, M_pad - M))
        t_row = t_flat.reshape(1, M_pad)

        slab = pl.pallas_call(
            _slab_kernel,
            out_shape=jax.ShapeDtypeStruct((two_f, M_pad), jnp.float32),
            grid_spec=pltpu.PrefetchScalarGridSpec(
                num_scalar_prefetch=0,
                grid=(M_pad // tm,),
                in_specs=[
                    pl.BlockSpec((F, 1), lambda i: (0, 0)),      # coefs, resident
                    pl.BlockSpec((1, tm), lambda i: (0, i)),     # timesteps on lanes
                ],
                out_specs=pl.BlockSpec((two_f, tm), lambda i: (0, i)),
            ),
            compiler_params=pltpu.CompilerParams(
                dimension_semantics=("parallel",),
                vmem_limit_bytes=_VMEM_LIMIT_BYTES),
        )(self._coefs_col, t_row)
        # Layout plumbing outside the kernel: [2F, M] -> [M, 2F] (matches torch.cat(..., dim=1)).
        # The packed [M/8, 8*2F] output (review item 6) was evaluated but not adopted: it needs
        # an in-kernel lane->sublane relayout or an MXU expansion matmul whose f32 cost is
        # comparable to the HBM writeback it would save for this tiny-F path.
        return slab[:, :M].T


def _reference_forward(fourier_coefs: np.ndarray, t: np.ndarray) -> np.ndarray:
    t_flat = t.reshape(-1).astype(np.float32)
    raw = fourier_coefs * t_flat[:, None]
    return np.concatenate([np.sin(raw), np.cos(raw)], axis=1)


if __name__ == "__main__":
    key = jax.random.PRNGKey(0)

    # Small, module-consistent shapes: batch=2, frames-per-sample=8.
    B, N = 2, 8
    max_num_frames = 256          # -> time_resolution=256, F=8 fourier feats, dim=16
    t = jax.random.randint(key, (B, N), 0, max_num_frames).astype(jnp.int32)

    # --- log-spaced frequencies path (default, tiny F -> slab kernel) ---
    enc = FixedTimeEncoder(max_num_frames=max_num_frames)
    out = jax.block_until_ready(enc(t))
    ref = _reference_forward(np.asarray(enc.fourier_coefs), np.asarray(t))
    assert out.shape == (B * N, enc.get_dim()), out.shape
    np.testing.assert_allclose(np.asarray(out), ref, rtol=1e-5, atol=5e-5)

    # --- same path, larger M: exercises >=2 grid steps + timestep padding ---
    t_big = jax.random.randint(jax.random.fold_in(key, 1), (4, 300), 0, max_num_frames)
    t_big = t_big.astype(jnp.int32)
    out_big = jax.block_until_ready(enc(t_big))
    ref_big = _reference_forward(np.asarray(enc.fourier_coefs), np.asarray(t_big))
    assert out_big.shape == (4 * 300, enc.get_dim()), out_big.shape
    np.testing.assert_allclose(np.asarray(out_big), ref_big, rtol=1e-5, atol=5e-5)

    # --- transformer positional-encoding path (F=256 -> direct [M, 2F] kernel) ---
    enc_pe = FixedTimeEncoder(max_num_frames=max_num_frames, transformer_pe=True, d_model=512)
    out_pe = jax.block_until_ready(enc_pe(t))
    ref_pe = _reference_forward(np.asarray(enc_pe.fourier_coefs), np.asarray(t))
    assert out_pe.shape == (B * N, enc_pe.get_dim()), out_pe.shape
    np.testing.assert_allclose(np.asarray(out_pe), ref_pe, rtol=1e-5, atol=5e-5)

    print("KERNEL_OK")
</pallas_src>

<mosaic_0001>
module attributes {stable_mosaic.version = 11 : i64} {
  func.func @_slab_kernel(%arg0: i32, %arg1: memref<8x1xf32, #tpu.memory_space<vmem>>, %arg2: memref<1x128xf32, #tpu.memory_space<vmem>>, %arg3: memref<16x128xf32, #tpu.memory_space<vmem>>) attributes {dimension_semantics = [#tpu.dimension_semantics<parallel>], iteration_bounds = array<i64: 1>, scalar_prefetch = 0 : i64, scratch_operands = 0 : i64, tpu.core_type = #tpu.core_type<tc>, window_params = [{pipeline_mode = #tpu.pipeline_mode<synchronous>, transform_indices = @transform_0, window_bounds = array<i64: 8, 1>}, {transform_indices = @transform_1, window_bounds = array<i64: 1, 128>}, {transform_indices = @transform_2, window_bounds = array<i64: 16, 128>}]} {
    %c0 = arith.constant 0 : index
    %c0_0 = arith.constant 0 : index
    %0 = vector.load %arg1[%c0, %c0_0] : memref<8x1xf32, #tpu.memory_space<vmem>>, vector<8x1xf32>
    %c0_1 = arith.constant 0 : index
    %c0_2 = arith.constant 0 : index
    %1 = vector.load %arg2[%c0_1, %c0_2] : memref<1x128xf32, #tpu.memory_space<vmem>>, vector<1x128xf32>
    %2 = vector.broadcast %0 : vector<8x1xf32> to vector<8x128xf32>
    %3 = vector.broadcast %1 : vector<1x128xf32> to vector<8x128xf32>
    %4 = arith.mulf %2, %3 : vector<8x128xf32>
    %5 = math.sin %4 : vector<8x128xf32>
    %c0_3 = arith.constant 0 : index
    %c0_4 = arith.constant 0 : index
    %6 = vector.load %arg3[%c0_3, %c0_4] : memref<16x128xf32, #tpu.memory_space<vmem>>, vector<8x128xf32>
    tpu.vector_store %arg3[%c0_3, %c0_4], %5 {strides = array<i32>} : memref<16x128xf32, #tpu.memory_space<vmem>>, vector<8x128xf32>,
    %7 = math.cos %4 : vector<8x128xf32>
    %c8 = arith.constant 8 : index
    %c0_5 = arith.constant 0 : index
    %8 = vector.load %arg3[%c8, %c0_5] : memref<16x128xf32, #tpu.memory_space<vmem>>, vector<8x128xf32>
    tpu.vector_store %arg3[%c8, %c0_5], %7 {strides = array<i32>} : memref<16x128xf32, #tpu.memory_space<vmem>>, vector<8x128xf32>,
    return
  }
  func.func @transform_0(%arg0: i32) -> (i32, i32) {
    %c0_i32 = arith.constant 0 : i32
    %c0_i32_0 = arith.constant 0 : i32
    %c0_i32_1 = arith.constant 0 : i32
    return %c0_i32, %c0_i32_0 : i32, i32
  }
  func.func @transform_1(%arg0: i32) -> (i32, i32) {
    %c0_i32 = arith.constant 0 : i32
    %c0_i32_0 = arith.constant 0 : i32
    return %c0_i32, %arg0 : i32, i32
  }
  func.func @transform_2(%arg0: i32) -> (i32, i32) {
    %c0_i32 = arith.constant 0 : i32
    %c0_i32_0 = arith.constant 0 : i32
    return %c0_i32, %arg0 : i32, i32
  }
}

</mosaic_0001>

<bundles_post_ra>
// kernel: tpu_custom_call.1
= control target key start
LH: loop header
LB: loop body
LE: loop exit
PB: predicated region body
PF: predicated region fallthrough
CT: control target
= control target key end

     0   :  { %v396_v1 = vmov 0   ;;  %s491_s0 = inlined_call_operand.vmem [shape: f32[8,1], index: 0, kind: input, shape index: {}]   ;;  %s492_s1 = inlined_call_operand.vmem [shape: f32[1,128], index: 1, kind: input, shape index: {}]   ;;  %s493_s2 = inlined_call_operand.hbm [shape: f32[16,128], index: 2, kind: output, shape index: {}]  }
   0x1   :  { %v12_v0 = vld [vmem:[%s491_s0] sm:$0xff]  ;;  %368 = vset.pattern.permute.xlu0 %v396_v1 }
   0x2   :  { %16 = vperm.xlu0 %368, %v12_v0  }
   0x3   :  { %7 = vsyncpa [#allocation3], 0  ;;  %v369_v2 = vld [vmem:[%s492_s1] ss:$0 sm:$0xff]  ;;  %v397_v16 = vmov 683565275  }
   0x4   :  { %v398_v18 = vmov 2475754826   ;;  %v399_v21 = vmov 2131351028   ;;  %v400_v24 = vmov 2102212464  }
   0x5   :  { %v401_v27 = vmov 920167782   ;;  %v402_v30 = vmov 1326507024   ;;  %s403_s0 = smov [#allocation2]   ;;  %s340_s15 = sshll.u32 %s493_s2, 4  ;;  %s341_s15 = int_to_ptr.hbm [resolvable:$true] %s340_s15 }
   0x6   :  { %s338_s1 = sshll.u32 %s403_s0, 4  ;;  %s404_s16 = smov 128   ;;  %s339_s1 = int_to_ptr.vmem [resolvable:$true] %s338_s1 }
   0x7   :  { %s405_s2 = smov 8  }
  0x74   :  { %v17_v3 = vpop.permute.xlu0 %16 }
  0x75   :  { %v428_v4 = vmul.f32 %v369_v2, %v17_v3 }
  0x77   :  { %v26_v5 = vand.u32 2139095040, %v428_v4  ;;  %v23_v8 = vand.u32 2147483647, %v428_v4  ;;  %vm25_vm12 = vcmp.lt.s32.totalorder %v428_v4, 0 }
  0x79   :  { %v27_v6 = vshrl.u32 %v26_v5, 23  ;;  %v30_v10 = vand.u32 8388607, %v23_v8  ;;  %vm24_vm13 = vcmp.le.f32.partialorder %v23_v8, 0.7853982 }
  0x7b   :  { %v352_v7 = vadd.s32 4294967169, %v27_v6  ;;  %v31_v14 = vor.u32 8388608, %v30_v10 }
  0x7d   :  { %v33_v9 = vadd.s32 1, %v352_v7  ;;  %v445_v37 = vshll.u32 %v31_v14, 8 }
  0x7f   :  { %vm34_vm0 = vcmp.gt.s32.totalorder %v33_v9, 0  ;;  %v72_v46 = vand.u32 65535, %v445_v37  ;;  %v73_v47 = vshrl.u32 %v445_v37, 16 }
  0x80   :  { %v35_v11 = vsel %vm34_vm0, %v33_v9, 0 }
  0x81   :  { %v37_v12 = vand.u32 31, %v35_v11  ;;  %v436_v15 = vshrl.u32 %v35_v11, 5 }
  0x83   :  { %v434_v13 = vsub.s32 32, %v37_v12  ;;  %v40_v17 = vshll.u32 %v397_v16, %v37_v12  ;;  %v43_v19 = vshll.u32 %v398_v18, %v37_v12  ;;  %v46_v23 = vshll.u32 %v399_v21, %v37_v12 }
  0x84   :  { %v49_v26 = vshll.u32 %v400_v24, %v37_v12  ;;  %v52_v29 = vshll.u32 %v401_v27, %v37_v12  ;;  %vm55_vm1 = vcmp.lt.s32.totalorder %v436_v15, 1  ;;  %vm58_vm2 = vcmp.lt.s32.totalorder %v436_v15, 4 }
  0x85   :  { %v41_v20 = vshrl.u32 %v398_v18, %v434_v13  ;;  %v44_v22 = vshrl.u32 %v399_v21, %v434_v13  ;;  %v47_v25 = vshrl.u32 %v400_v24, %v434_v13  ;;  %v50_v28 = vshrl.u32 %v401_v27, %v434_v13 }
  0x86   :  { %v53_v31 = vshrl.u32 %v402_v30, %v434_v13  ;;  %vm57_vm3 = vcmp.lt.s32.totalorder %v436_v15, 3  ;;  %vm56_vm4 = vcmp.lt.s32.totalorder %v436_v15, 2  ;;  %v39_v11 = vshrl.u32 %v397_v16, %v434_v13 }
  0x87   :  { %v42_v32 = vor.u32 %v41_v20, %v40_v17  ;;  %v45_v33 = vor.u32 %v44_v22, %v43_v19  ;;  %v48_v34 = vor.u32 %v47_v25, %v46_v23  ;;  %v51_v35 = vor.u32 %v50_v28, %v49_v26 }
  0x88   :  { %v54_v36 = vor.u32 %v53_v31, %v52_v29 }
  0x89   :  { %v63_v38 = vsel %vm55_vm1, %v42_v32, %v45_v33  ;;  %v67_v39 = vsel %vm55_vm1, %v45_v33, %v48_v34  ;;  %v64_v40 = vsel %vm58_vm2, %v51_v35, 920167782  ;;  %v60_v7 = vsel %vm58_vm2, %v48_v34, 2102212464 }
  0x8a   :  { %v68_v41 = vsel %vm58_vm2, %v54_v36, 1326507024  ;;  %v65_v42 = vsel %vm57_vm3, %v48_v34, %v64_v40  ;;  %v59_v20 = vsel %vm55_vm1, %v39_v11, %v42_v32  ;;  %v61_v21 = vsel %vm57_vm3, %v45_v33, %v60_v7 }
  0x8b   :  { %v69_v43 = vsel %vm57_vm3, %v51_v35, %v68_v41  ;;  %v66_v44 = vsel %vm56_vm4, %v63_v38, %v65_v42  ;;  %v62_v13 = vsel %vm56_vm4, %v59_v20, %v61_v21 }
  0x8c   :  { %v70_v45 = vsel %vm56_vm4, %v67_v39, %v69_v43  ;;  %v96_v50 = vand.u32 65535, %v66_v44  ;;  %v97_v51 = vshrl.u32 %v66_v44, 16  ;;  %v116_v28 = vmul.u32 %v445_v37, %v62_v13 }
  0x8d   :  { %v74_v48 = vand.u32 65535, %v70_v45  ;;  %v75_v49 = vshrl.u32 %v70_v45, 16  ;;  %vm166_vm4 = vweird.f32 %v428_v4 }
  0x8e   :  { %v99_v54 = vmul.u32 %v97_v51, %v72_v46  ;;  %v100_v55 = vmul.u32 %v96_v50, %v73_v47  ;;  %v98_v59 = vmul.u32 %v96_v50, %v72_v46  ;;  %v101_v63 = vmul.u32 %v97_v51, %v73_v47 }
  0x8f   :  { %v77_v52 = vmul.u32 %v75_v49, %v72_v46  ;;  %v78_v53 = vmul.u32 %v74_v48, %v73_v47  ;;  %v76_v56 = vmul.u32 %v74_v48, %v72_v46  ;;  %v79_v58 = vmul.u32 %v75_v49, %v73_v47 }
  0x90   :  { %v102_v60 = vshll.u32 %v99_v54, 16  ;;  %v104_v2 = vshll.u32 %v100_v55, 16  ;;  %v103_v18 = vshrl.u32 %v99_v54, 16  ;;  %v105_v24 = vshrl.u32 %v100_v55, 16 }
  0x91   :  { %v80_v57 = vshll.u32 %v77_v52, 16  ;;  %v82_v61 = vshll.u32 %v78_v53, 16  ;;  %v81_v12 = vshrl.u32 %v77_v52, 16  ;;  %v83_v22 = vshrl.u32 %v78_v53, 16 }
  0x92   :  { %vm106_vm6 = vc.u32 %v98_v59, %v102_v60  ;;  %v108_v3 = vadd.s32 %v102_v60, %v98_v59 }
  0x93   :  { %vm84_vm5 = vc.u32 %v76_v56, %v80_v57  ;;  %v86_v62 = vadd.s32 %v80_v57, %v76_v56  ;;  %v107_v6 = vsel %vm106_vm6, 1, %v396_v1 }
  0x94   :  { %v85_v0 = vsel %vm84_vm5, 1, %v396_v1  ;;  %v109_v10 = vadd.s32 %v107_v6, %v101_v63  ;;  %vm110_vm8 = vc.u32 %v108_v3, %v104_v2  ;;  %v112_v27 = vadd.s32 %v108_v3, %v104_v2 }
  0x95   :  { %v87_v5 = vadd.s32 %v85_v0, %v79_v58  ;;  %vm88_vm7 = vc.u32 %v86_v62, %v82_v61  ;;  %v111_v17 = vsel %vm110_vm8, 1, %v396_v1 }
  0x96   :  { %v89_v9 = vsel %vm88_vm7, 1, %v396_v1  ;;  %v113_v19 = vadd.s32 %v111_v17, %v109_v10 }
  0x97   :  { %v91_v14 = vadd.s32 %v89_v9, %v87_v5 }
  0x98   :  { %v114_v25 = vadd.s32 %v113_v19, %v103_v18 }
  0x99   :  { %v92_v23 = vadd.s32 %v91_v14, %v81_v12 }
  0x9a   :  { %v115_v16 = vadd.s32 %v114_v25, %v105_v24 }
  0x9b   :  { %v93_v26 = vadd.s32 %v92_v23, %v83_v22 }
  0x9c   :  { %v119_v1 = vadd.s32 1, %v115_v16 }
  0x9d   :  { %vm118_vm9 = vc.u32 %v93_v26, %v112_v27  ;;  %v117_v15 = vadd.s32 %v112_v27, %v93_v26 }
  0x9e   :  { %v120_v29 = vsel %vm118_vm9, %v119_v1, %v115_v16 }
  0x9f   :  { %v121_v30 = vadd.s32 %v120_v29, %v116_v28 }
  0xa1   :  { %v122_v31 = vadd.s32 536870912, %v121_v30 }
  0xa3   :  { %v123_v32 = vshrl.u32 %v122_v31, 30 }
  0xa5   :  { %v124_v34 = vshll.u32 %v123_v32, 30  ;;  %v147_v53 = vsub.s32 4, %v123_v32 }
  0xa7   :  { %v125_v33 = vsub.s32 %v121_v30, %v124_v34  ;;  %v148_v58 = vsel %vm25_vm12, %v147_v53, %v123_v32 }
  0xa8   :  { %v150_v61 = vsel %vm24_vm13, 0, %v148_v58 }
  0xa9   :  { %vm126_vm10 = vcmp.lt.s32.totalorder %v125_v33, 0  ;;  %v127_v35 = vsub.s32 0, %v125_v33  ;;  %v167_v3 = vadd.s32 3, %v150_v61  ;;  %v323_v8 = vand.u32 3, %v150_v61 }
  0xab   :  { %v128_v36 = vsel %vm126_vm10, %v127_v35, %v125_v33  ;;  %v168_v10 = vand.u32 3, %v167_v3  ;;  %vm324_vm14 = vcmp.lt.s32.totalorder %v323_v8, 2  ;;  %vm325_vm15 = vcmp.eq.s32.totalorder %v323_v8, 0 }
  0xac   :  { %v129_v38 = vclz %v128_v36  ;;  %vm328_vm3 = vcmp.eq.s32.totalorder %v323_v8, 2 }
  0xad   :  { %vm169_vm0 = vcmp.lt.s32.totalorder %v168_v10, 2  ;;  %vm170_vm1 = vcmp.eq.s32.totalorder %v168_v10, 0  ;;  %vm173_vm2 = vcmp.eq.s32.totalorder %v168_v10, 2 }
  0xae   :  { %v353_v39 = vadd.s32 4294967294, %v129_v38 }
  0xb0   :  { %vm354_vm11 = vcmp.lt.s32.totalorder %v353_v39, 0 }
  0xb1   :  { %v132_v40 = vsel %vm354_vm11, 0, %v353_v39 }
  0xb2   :  { %v133_v41 = vsub.s32 32, %v132_v40  ;;  %v137_v42 = vsub.s32 4294967266, %v132_v40  ;;  %v134_v43 = vshll.u32 %v125_v33, %v132_v40 }
  0xb4   :  { %v135_v44 = vshrl.u32 %v117_v15, %v133_v41  ;;  %v138_v45 = vadd.s32 127, %v137_v42 }
  0xb6   :  { %v136_v37 = vor.u32 %v135_v44, %v134_v43  ;;  %v139_v46 = vshll.u32 %v138_v45, 23 }
  0xb8   :  { %v140_v47 = vor.u32 4788187, %v139_v46  ;;  %v143_v49 = vcvt.s32.f32 %v136_v37 }
  0xba   :  { %v141_v48 = vand.u32 2147483647, %v140_v47 }
  0xbc   :  { %v144_v50 = vmul.f32 %v143_v49, %v141_v48 }
  0xbe   :  { %v145_v51 = vxor.u32 2147483648, %v144_v50 }
  0xc0   :  { %v146_v52 = vsel %vm25_vm12, %v145_v51, %v144_v50 }
  0xc1   :  { %v149_v54 = vsel %vm24_vm13, %v428_v4, %v146_v52 }
  0xc2   :  { %v151_v55 = vmul.f32 %v149_v54, %v149_v54 }
  0xc4   :  { %v159_v56 = vmul.f32 -0.00019511016, %v151_v55  ;;  %v152_v57 = vmul.f32 -0.001358992, %v151_v55 }
  0xc6   :  { %v160_v59 = vadd.f32 0.008332121, %v159_v56  ;;  %v153_v60 = vadd.f32 0.041655596, %v152_v57 }
  0xc8   :  { %v161_v62 = vmul.f32 %v160_v59, %v151_v55  ;;  %v154_v63 = vmul.f32 %v153_v60, %v151_v55 }
  0xca   :  { %v162_v0 = vadd.f32 -0.16666654, %v161_v62  ;;  %v155_v2 = vadd.f32 -0.4999988, %v154_v63 }
  0xcc   :  { %v163_v5 = vmul.f32 %v162_v0, %v151_v55  ;;  %v156_v6 = vmul.f32 %v155_v2, %v151_v55 }
  0xce   :  { %v164_v7 = vadd.f32 1.0, %v163_v5  ;;  %v157_v9 = vadd.f32 1.0, %v156_v6 }
  0xd0   :  { %v165_v11 = vmul.f32 %v164_v7, %v149_v54  ;;  %v174_v12 = vxor.u32 2147483648, %v157_v9 }
  0xd2   :  { %v171_v14 = vxor.u32 2147483648, %v165_v11  ;;  %v175_v18 = vsel %vm173_vm2, %v174_v12, %v165_v11  ;;  %v330_v20 = vsel %vm328_vm3, %v174_v12, %v165_v11 }
  0xd4   :  { %v172_v17 = vsel %vm170_vm1, %v157_v9, %v171_v14  ;;  %v327_v19 = vsel %vm325_vm15, %v157_v9, %v171_v14 }
  0xd5   :  { %v176_v21 = vsel %vm169_vm0, %v172_v17, %v175_v18  ;;  %v331_v22 = vsel %vm324_vm14, %v327_v19, %v330_v20 }
  0xd6   :  { %v177_v23 = vsel %vm166_vm4, nan, %v176_v21  ;;  %v332_v24 = vsel %vm166_vm4, nan, %v331_v22 }
  0xd7   :  { %178 = vst [vmem:[#allocation2] sm:$0xff] %v177_v23 }
  0xd8   :  { %333 = vst [vmem:[#allocation2 + $0x8] sm:$0xff] %v332_v24 }
  0xd9   :  { %346 = dma.vmem_to_hbm [thread:$0]  %s339_s1, 256, %s341_s15, [#allocation3], %s404_s16, %s404_s16, %s405_s2  }
  0xda   :  { %394 = dma.done.wait [#allocation3], 256  }
  0xdb   :  { %395 = vsyncadd [#allocation3], 4294967040 }
  0xdc   :  { %351 = vsyncpa [#allocation3], 1 }

</bundles_post_ra>
